<compile_context>
chip_gen: v7x
topology: tpu7x:2x2x1
jax: 0.10.0
libtpu: 0.0.40
codegen_flags: <defaults>
</compile_context>

<pallas_src>
import math

import jax
import jax.numpy as jnp
from jax.experimental import pallas as pl
from jax.experimental.pallas import tpu as pltpu


def _round_up(x, m):
    return ((x + m - 1) // m) * m


def _choose_tile(d_pad, cap, align):
    """Pick a tile size for an (already align-padded) dimension of size d_pad.

    Prefers the largest multiple of `align` <= cap that divides d_pad (so no
    padding beyond the minimal alignment is ever materialized). If the best
    divisor is pathologically small (< cap/2), fall back to `cap` and accept
    padding to a tile multiple (bigger tiles win over a one-off pad).
    """
    cap = min(cap, d_pad)
    cap -= cap % align
    cap = max(cap, align)
    t = cap
    while t >= align:
        if d_pad % t == 0:
            break
        t -= align
    t = max(t, align)
    if t * 2 >= cap:
        return t
    return cap


def _linear_kernel_f32out(x_ref, w_ref, b_ref, o_ref):
    """f32 output: accumulate directly into the resident output tile.

    Saves tm*tn*4 bytes of VMEM scratch and the epilogue acc->out copy.
    """
    k = pl.program_id(2)

    @pl.when(k == 0)
    def _init():
        o_ref[...] = jnp.zeros_like(o_ref)

    # Hot loop: pure MXU accumulate in f32.
    o_ref[...] += jnp.dot(
        x_ref[...], w_ref[...], preferred_element_type=jnp.float32
    )

    # Epilogue: bias add (VPU), once per output tile.
    @pl.when(k == pl.num_programs(2) - 1)
    def _bias():
        o_ref[...] += b_ref[...]


def _linear_kernel_scratch(x_ref, w_ref, b_ref, o_ref, acc_ref):
    """Narrow output dtype (e.g. bf16): f32 VMEM accumulator + cast on store."""
    k = pl.program_id(2)

    @pl.when(k == 0)
    def _init():
        acc_ref[...] = jnp.zeros_like(acc_ref)

    acc_ref[...] += jnp.dot(
        x_ref[...], w_ref[...], preferred_element_type=jnp.float32
    )

    @pl.when(k == pl.num_programs(2) - 1)
    def _store():
        o_ref[...] = (
            acc_ref[...] + b_ref[...].astype(jnp.float32)
        ).astype(o_ref.dtype)


def linear_forward(x, weight, bias, *, tm=512, tn=512, tk=1024,
                   full_m_max=1024, compute_dtype=None):
    """y = x @ weight + bias via a tiled, pipelined Pallas kernel.

    x:      (M, K)
    weight: (K, N)     -- same storage layout as the PyTorch module
    bias:   (N,)
    compute_dtype: optionally cast x/W (e.g. jnp.bfloat16) for MXU speed.
    returns (M, N) in x.dtype
    """
    M, K = x.shape
    K2, N = weight.shape
    assert K == K2, "in_features mismatch"
    out_dtype = x.dtype

    if compute_dtype is not None:
        x = x.astype(compute_dtype)
        weight = weight.astype(compute_dtype)

    # ---- tile selection ---------------------------------------------------
    Mp8 = _round_up(M, 8)
    Np128 = _round_up(N, 128)
    Kp128 = _round_up(K, 128)

    if Mp8 <= full_m_max:
        tm = Mp8                                  # full-M: W streams once
    else:
        tm = _choose_tile(Mp8, tm, 8)
    tn = _choose_tile(Np128, tn, 128)
    tk = _choose_tile(Kp128, tk, 128)

    Mp = _round_up(M, tm)
    Np = _round_up(N, tn)
    Kp = _round_up(K, tk)

    # Pad only when required (K padding adds zeros to the dot; M/N padding is
    # sliced off). In production, pre-pad weight/bias once at init time.
    x_p = x if (Mp, Kp) == (M, K) else jnp.pad(x, ((0, Mp - M), (0, Kp - K)))
    w_p = (
        weight
        if (Kp, Np) == (K, N)
        else jnp.pad(weight, ((0, Kp - K), (0, Np - N)))
    )
    b_p = bias if Np == N else jnp.pad(bias, (0, Np - N))
    b2d = b_p.reshape(1, Np)          # 2-D for TPU vreg layout

    grid = (Mp // tm, Np // tn, Kp // tk)

    acc_in_out = out_dtype == jnp.float32
    kernel = _linear_kernel_f32out if acc_in_out else _linear_kernel_scratch
    scratch = [] if acc_in_out else [pltpu.VMEM((tm, tn), jnp.float32)]

    in_sz = jnp.dtype(x_p.dtype).itemsize
    w_sz = jnp.dtype(w_p.dtype).itemsize
    b_sz = jnp.dtype(b2d.dtype).itemsize
    out_sz = jnp.dtype(out_dtype).itemsize

    cost = pl.CostEstimate(
        flops=2 * M * N * K,
        transcendentals=0,
        bytes_accessed=(x.size * in_sz + weight.size * w_sz
                        + bias.size * b_sz + M * N * out_sz),
    )

    # Live VMEM: double-buffered x/W/out/bias tiles (+ f32 acc if used).
    live = (2 * (tm * tk * in_sz + tk * tn * w_sz + tm * tn * out_sz + tn * b_sz)
            + (0 if acc_in_out else tm * tn * 4))
    try:
        phys_vmem = int(pltpu.get_tpu_info().vmem_capacity_bytes)
    except Exception:
        phys_vmem = 64 << 20   # conservative: v7x per-TensorCore VMEM
    vmem_limit = int(min(phys_vmem * 3 // 4, max(32 << 20, 2 * live)))

    out_p = pl.pallas_call(
        kernel,
        out_shape=jax.ShapeDtypeStruct((Mp, Np), out_dtype),
        grid=grid,
        in_specs=[
            pl.BlockSpec((tm, tk), lambda i, j, k: (i, k)),   # x tile
            pl.BlockSpec((tk, tn), lambda i, j, k: (k, j)),   # W tile
            pl.BlockSpec((1, tn), lambda i, j, k: (0, j)),    # bias tile
        ],
        out_specs=pl.BlockSpec((tm, tn), lambda i, j, k: (i, j)),
        scratch_shapes=scratch,
        compiler_params=pltpu.CompilerParams(
            dimension_semantics=("parallel", "parallel", "arbitrary"),
            vmem_limit_bytes=vmem_limit,
        ),
        cost_estimate=cost,
    )(x_p, w_p, b2d)

    if (Mp, Np) != (M, N):
        out_p = out_p[:M, :N]
    return out_p


def init_params(key, in_features, out_features, dtype=jnp.float32):
    """Mirror the spec module's reset_parameters().

    Weight is stored (in_features, out_features), so PyTorch's
    _calculate_fan_in_and_fan_out gives fan_in = size(1) = out_features.
    """
    kw, kb = jax.random.split(key)
    a = math.sqrt(5.0)
    fan_in = out_features
    gain = math.sqrt(2.0 / (1.0 + a * a))
    w_bound = gain * math.sqrt(3.0 / fan_in)
    weight = jax.random.uniform(
        kw, (in_features, out_features), dtype, minval=-w_bound, maxval=w_bound
    )
    b_bound = 1.0 / math.sqrt(fan_in) if fan_in > 0 else 0.0
    bias = jax.random.uniform(
        kb, (out_features,), dtype, minval=-b_bound, maxval=b_bound
    )
    return weight, bias


if __name__ == "__main__":
    key = jax.random.PRNGKey(0)

    # --- Test 1: small shapes consistent with the module's 2-D forward. ---
    batch, in_features, out_features = 8, 32, 16
    kx, kp, key = jax.random.split(key, 3)
    x = jax.random.normal(kx, (batch, in_features), jnp.float32)
    weight, bias = init_params(kp, in_features, out_features)

    y = jax.block_until_ready(linear_forward(x, weight, bias))
    y_ref = x @ weight + bias
    assert y.shape == (batch, out_features)
    assert jnp.allclose(y, y_ref, atol=1e-4, rtol=1e-4)

    # --- Test 2: aligned shapes + small tile caps to exercise the full
    #     (i, j, k) grid and the K-reduction accumulate path. ---
    M2, K2, N2 = 64, 384, 256
    kx2, kp2 = jax.random.split(key)
    x2 = jax.random.normal(kx2, (M2, K2), jnp.float32)
    w2, b2 = init_params(kp2, K2, N2)

    y2 = jax.block_until_ready(
        linear_forward(x2, w2, b2, tn=128, tk=128)   # grid = (1, 2, 3)
    )
    y2_ref = x2 @ w2 + b2
    assert y2.shape == (M2, N2)
    assert jnp.allclose(y2, y2_ref, atol=5e-3, rtol=5e-3)

    print("KERNEL_OK")
</pallas_src>

<mosaic_0001>
module attributes {stable_mosaic.version = 11 : i64} {
  func.func @_linear_kernel_f32out(%arg0: i32, %arg1: i32, %arg2: i32, %arg3: memref<8x128xf32, #tpu.memory_space<vmem>>, %arg4: memref<128x128xf32, #tpu.memory_space<vmem>>, %arg5: memref<1x128xf32, #tpu.memory_space<vmem>>, %arg6: memref<8x128xf32, #tpu.memory_space<vmem>>) attributes {dimension_semantics = [#tpu.dimension_semantics<parallel>, #tpu.dimension_semantics<parallel>, #tpu.dimension_semantics<arbitrary>], iteration_bounds = array<i64: 1, 1, 1>, scalar_prefetch = 0 : i64, scratch_operands = 0 : i64, tpu.core_type = #tpu.core_type<tc>, window_params = [{transform_indices = @transform_0, window_bounds = array<i64: 8, 128>}, {transform_indices = @transform_1, window_bounds = array<i64: 128, 128>}, {transform_indices = @transform_2, window_bounds = array<i64: 1, 128>}, {transform_indices = @transform_3, window_bounds = array<i64: 8, 128>}]} {
    %c0_i32 = arith.constant 0 : i32
    %0 = arith.cmpi eq, %arg2, %c0_i32 : i32
    %1 = arith.extui %0 : i1 to i32
    %c0_i32_0 = arith.constant 0 : i32
    %2 = arith.cmpi ne, %1, %c0_i32_0 : i32
    scf.if %2 {
      %cst_10 = arith.constant 0.000000e+00 : f32
      %12 = vector.broadcast %cst_10 : f32 to vector<8x128xf32>
      %c0_11 = arith.constant 0 : index
      %c0_12 = arith.constant 0 : index
      %13 = vector.load %arg6[%c0_11, %c0_12] : memref<8x128xf32, #tpu.memory_space<vmem>>, vector<8x128xf32>
      tpu.vector_store %arg6[%c0_11, %c0_12], %12 {strides = array<i32>} : memref<8x128xf32, #tpu.memory_space<vmem>>, vector<8x128xf32>,
    } else {
    }
    %c0 = arith.constant 0 : index
    %c0_1 = arith.constant 0 : index
    %3 = vector.load %arg6[%c0, %c0_1] : memref<8x128xf32, #tpu.memory_space<vmem>>, vector<8x128xf32>
    %c0_2 = arith.constant 0 : index
    %c0_3 = arith.constant 0 : index
    %4 = vector.load %arg3[%c0_2, %c0_3] : memref<8x128xf32, #tpu.memory_space<vmem>>, vector<8x128xf32>
    %c0_4 = arith.constant 0 : index
    %c0_5 = arith.constant 0 : index
    %5 = vector.load %arg4[%c0_4, %c0_5] : memref<128x128xf32, #tpu.memory_space<vmem>>, vector<128x128xf32>
    %cst = arith.constant dense<0.000000e+00> : vector<8x128xf32>
    %6 = tpu.matmul %4, %5, %cst {dimension_numbers = #tpu.dot_dimension_numbers<[1], [0], [0], [1], [0, 0, 1, 1], [], []>} : vector<8x128xf32>, vector<128x128xf32>, vector<8x128xf32> -> vector<8x128xf32>
    %7 = arith.addf %3, %6 : vector<8x128xf32>
    %c0_6 = arith.constant 0 : index
    %c0_7 = arith.constant 0 : index
    %8 = vector.load %arg6[%c0_6, %c0_7] : memref<8x128xf32, #tpu.memory_space<vmem>>, vector<8x128xf32>
    tpu.vector_store %arg6[%c0_6, %c0_7], %7 {strides = array<i32>} : memref<8x128xf32, #tpu.memory_space<vmem>>, vector<8x128xf32>,
    %c0_i32_8 = arith.constant 0 : i32
    %9 = arith.cmpi eq, %arg2, %c0_i32_8 : i32
    %10 = arith.extui %9 : i1 to i32
    %c0_i32_9 = arith.constant 0 : i32
    %11 = arith.cmpi ne, %10, %c0_i32_9 : i32
    scf.if %11 {
      %c0_10 = arith.constant 0 : index
      %c0_11 = arith.constant 0 : index
      %12 = vector.load %arg6[%c0_10, %c0_11] : memref<8x128xf32, #tpu.memory_space<vmem>>, vector<8x128xf32>
      %c0_12 = arith.constant 0 : index
      %c0_13 = arith.constant 0 : index
      %13 = vector.load %arg5[%c0_12, %c0_13] : memref<1x128xf32, #tpu.memory_space<vmem>>, vector<1x128xf32>
      %14 = vector.broadcast %13 : vector<1x128xf32> to vector<8x128xf32>
      %15 = arith.addf %12, %14 : vector<8x128xf32>
      %c0_14 = arith.constant 0 : index
      %c0_15 = arith.constant 0 : index
      %16 = vector.load %arg6[%c0_14, %c0_15] : memref<8x128xf32, #tpu.memory_space<vmem>>, vector<8x128xf32>
      tpu.vector_store %arg6[%c0_14, %c0_15], %15 {strides = array<i32>} : memref<8x128xf32, #tpu.memory_space<vmem>>, vector<8x128xf32>,
    } else {
    }
    return
  }
  func.func @transform_0(%arg0: i32, %arg1: i32, %arg2: i32) -> (i32, i32) {
    %c0_i32 = arith.constant 0 : i32
    return %arg0, %arg2 : i32, i32
  }
  func.func @transform_1(%arg0: i32, %arg1: i32, %arg2: i32) -> (i32, i32) {
    %c0_i32 = arith.constant 0 : i32
    return %arg2, %arg1 : i32, i32
  }
  func.func @transform_2(%arg0: i32, %arg1: i32, %arg2: i32) -> (i32, i32) {
    %c0_i32 = arith.constant 0 : i32
    %c0_i32_0 = arith.constant 0 : i32
    return %c0_i32, %arg1 : i32, i32
  }
  func.func @transform_3(%arg0: i32, %arg1: i32, %arg2: i32) -> (i32, i32) {
    %c0_i32 = arith.constant 0 : i32
    return %arg0, %arg1 : i32, i32
  }
}

</mosaic_0001>

<bundles_post_ra>
// kernel: tpu_custom_call.1
= control target key start
LH: loop header
LB: loop body
LE: loop exit
PB: predicated region body
PF: predicated region fallthrough
CT: control target
= control target key end

     0   :  { %8 = vsyncpa [#allocation3], 0  ;;  %s396_s0 = inlined_call_operand.hbm [shape: f32[8,128], index: 0, kind: input, shape index: {}]   ;;  %s397_s1 = inlined_call_operand.hbm [shape: f32[128,128], index: 1, kind: input, shape index: {}]   ;;  %s398_s2 = inlined_call_operand.vmem [shape: f32[1,128], index: 2, kind: input, shape index: {}]   ;;  %s399_s3 = inlined_call_operand.hbm [shape: f32[8,128], index: 3, kind: output, shape index: {}]  }
   0x1   :  { %9 = vsyncpa [#allocation6], 0 }
   0x2   :  { %10 = vsyncpa [#allocation4], 0  ;;  %s322_s12 = smov [#allocation2]   ;;  %s323_s14 = smov [#allocation5]  }
   0x3   :  { %s17_s13 = sshll.u32 %s322_s12, 4  ;;  %s26_s15 = sshll.u32 %s323_s14, 4  ;;  %s18_s13 = int_to_ptr.vmem [resolvable:$true] %s17_s13  ;;  %s350_s15 = int_to_ptr.vmem [resolvable:$true] %s26_s15 }
   0x4   :  { %s250_s18 = scalar_lea.hbm %s396_s0, 128 }
   0x5   :  { %p251_p0 = scmp.ne.s32.totalorder %s396_s0, %s250_s18  ;;  %p254_p1 = scmp.lt.u32.totalorder %s250_s18, %s396_s0 }
   0x7   :  { %p256_p2 = pnand %p254_p1, %p251_p0 }
   0x9   :  { %259 = shalt.err (!%p256_p2)
}
   0xa   :  { %s260_s23 = scalar_lea.vmem %s18_s13, 128  ;;  %p265_p4 = scmp.lt.s32.totalorder %s18_s13, %s18_s13 }
   0xb   :  { %p261_p3 = scmp.ne.s32.totalorder %s18_s13, %s260_s23  ;;  %p266_p5 = scmp.lt.s32.totalorder %s260_s23, %s260_s23 }
   0xd   :  { %p267_p6 = por %p266_p5, %p265_p4 }
   0xf   :  { %p268_p7 = pnand %p267_p6, %p261_p3 }
  0x11   :  { %271 = shalt.err (!%p268_p7)
}
  0x12   :  { %20 = dma.hbm_to_vmem [thread:$0]  %s396_s0, 128, %s18_s13, [#allocation3]  }
  0x13   :  { %s272_s28 = scalar_lea.hbm %s397_s1, 2048 }
  0x14   :  { %p273_p8 = scmp.ne.s32.totalorder %s397_s1, %s272_s28  ;;  %p276_p9 = scmp.lt.u32.totalorder %s272_s28, %s397_s1 }
  0x16   :  { %p278_p10 = pnand %p276_p9, %p273_p8 }
  0x18   :  { %281 = shalt.err (!%p278_p10)
}
  0x19   :  { %s282_s6 = scalar_lea.vmem %s350_s15, 2048  ;;  %p287_p12 = scmp.lt.s32.totalorder %s350_s15, %s350_s15 }
  0x1a   :  { %p283_p11 = scmp.ne.s32.totalorder %s350_s15, %s282_s6  ;;  %p288_p13 = scmp.lt.s32.totalorder %s282_s6, %s282_s6 }
  0x1c   :  { %p289_p0 = por %p288_p13, %p287_p12 }
  0x1e   :  { %p290_p1 = pnand %p289_p0, %p283_p11 }
  0x20   :  { %293 = shalt.err (!%p290_p1)
}
  0x21   :  { %s324_s0 = smov 128   ;;  %s325_s7 = smov 8  }
  0x22   :  { %32 = dma.hbm_to_vmem [thread:$0]  %s397_s1, 2048, %s350_s15, [#allocation6], %s324_s0, %s324_s0, %s325_s7  }
  0x23   :  { %316 = dma.done.wait [#allocation3], 128  }
  0x24   :  { %317 = vsyncadd [#allocation3], 4294967168 }
  0x25   :  { %318 = dma.done.wait [#allocation6], 2048  }
  0x26   :  { %319 = vsyncadd [#allocation6], 4294965248  ;;  %v326_v0 = vmov 0.0|0.0   ;;  %vm327_vm0 = vmmov 0   ;;  %v328_v1 = vmov 0.0   ;;  %v48_v2 = vld [vmem:[#allocation5] sm:$0xff] }
  0x27   :  { %218 = vmatprep.subr.bf16.mxu0 %v326_v0  ;;  %215 = vmatprep.mubr.msk.f32.mxu0 %vm327_vm0, %v328_v1  ;;  %v49_v3 = vld [vmem:[#allocation5 + $0x8] sm:$0xff]  ;;  %v50_v4 = vld [vmem:[#allocation5 + $0x10] sm:$0xff]  ;;  %v51_v6 = vld [vmem:[#allocation5 + $0x18] sm:$0xff]  ;;  %s329_s11 = smov [#allocation7]  }
  0x28   :  { %v219_v5 = vpack.c.bf16 %v49_v3, %v48_v2  ;;  %v222_v7 = vpack.c.bf16 %v51_v6, %v50_v4  ;;  %v52_v8 = vld [vmem:[#allocation5 + $0x20] sm:$0xff]  ;;  %v53_v9 = vld [vmem:[#allocation5 + $0x28] sm:$0xff]  ;;  %v54_v11 = vld [vmem:[#allocation5 + $0x30] sm:$0xff]  ;;  %s155_s12 = sshll.u32 %s329_s11, 4  ;;  %s156_s12 = int_to_ptr.vmem [resolvable:$true] %s155_s12 }
  0x29   :  { %v225_v10 = vpack.c.bf16 %v53_v9, %v52_v8  ;;  %v55_v12 = vld [vmem:[#allocation5 + $0x38] sm:$0xff]  ;;  %v56_v14 = vld [vmem:[#allocation5 + $0x40] sm:$0xff]  ;;  %v57_v15 = vld [vmem:[#allocation5 + $0x48] sm:$0xff]  ;;  %s294_s13 = scalar_lea.vmem %s156_s12, 128  ;;  %p299_p3 = scmp.lt.s32.totalorder %s156_s12, %s156_s12 }
  0x2a   :  { %220 = vmatpush3.bf16.msra.mxu0 %v219_v5  ;;  %v228_v13 = vpack.c.bf16 %v55_v12, %v54_v11  ;;  %v231_v16 = vpack.c.bf16 %v57_v15, %v56_v14  ;;  %v58_v17 = vld [vmem:[#allocation5 + $0x50] sm:$0xff]  ;;  %v59_v18 = vld [vmem:[#allocation5 + $0x58] sm:$0xff]  ;;  %v60_v20 = vld [vmem:[#allocation5 + $0x60] sm:$0xff]  ;;  %p295_p2 = scmp.ne.s32.totalorder %s156_s12, %s294_s13  ;;  %p300_p4 = scmp.lt.s32.totalorder %s294_s13, %s294_s13 }
  0x2b   :  { %221 = vmatprep.subr.bf16.mxu0 %v326_v0  ;;  %v234_v19 = vpack.c.bf16 %v59_v18, %v58_v17  ;;  %v61_v21 = vld [vmem:[#allocation5 + $0x68] sm:$0xff]  ;;  %v62_v23 = vld [vmem:[#allocation5 + $0x70] sm:$0xff]  ;;  %v63_v24 = vld [vmem:[#allocation5 + $0x78] sm:$0xff] }
  0x2c   :  { %v237_v22 = vpack.c.bf16 %v61_v21, %v60_v20  ;;  %v240_v25 = vpack.c.bf16 %v63_v24, %v62_v23  ;;  %v47_v26 = vld [vmem:[#allocation2] sm:$0xff]  ;;  %p301_p5 = por %p300_p4, %p299_p3 }
  0x2d   :  { %v165_v28 = vld [vmem:[%s398_s2] ss:$0 sm:$0xff] }
  0x2e   :  { %223 = vmatpush3.bf16.msra.mxu0 %v222_v7  ;;  %p302_p6 = pnand %p301_p5, %p295_p2 }
  0x2f   :  { %224 = vmatprep.subr.bf16.mxu0 %v326_v0 }
  0x32   :  { %226 = vmatpush3.bf16.msra.mxu0 %v225_v10 }
  0x33   :  { %227 = vmatprep.subr.bf16.mxu0 %v326_v0 }
  0x36   :  { %229 = vmatpush3.bf16.msra.mxu0 %v228_v13 }
  0x37   :  { %230 = vmatprep.subr.bf16.mxu0 %v326_v0 }
  0x3a   :  { %232 = vmatpush3.bf16.msra.mxu0 %v231_v16 }
  0x3b   :  { %233 = vmatprep.subr.bf16.mxu0 %v326_v0 }
  0x3e   :  { %235 = vmatpush3.bf16.msra.mxu0 %v234_v19 }
  0x3f   :  { %236 = vmatprep.subr.bf16.mxu0 %v326_v0 }
  0x42   :  { %238 = vmatpush3.bf16.msra.mxu0 %v237_v22 }
  0x43   :  { %239 = vmatprep.subr.bf16.mxu0 %v326_v0 }
  0x46   :  { %241 = vmatpush3.bf16.msra.mxu0 %v240_v25 }
  0x49   :  { %216 = vmatmul.mubr.f32.vlgmr.msra.gmra.mrb[0].mxu0 %v47_v26 }
 0x11c   :  { %v130_v27 = vpop.f32.mrb[0].mxu0 }
 0x11d   :  { %v217_v29 = vpop.f32.mrb[1].mxu0  ;;  %v147_v30 = vadd.f32 %v165_v28, %v130_v27 }
 0x11f   :  { %148 = vst [vmem:[#allocation7] sm:$0xff] %v147_v30 }
 0x120   :  { %305 = shalt.err (!%p302_p6)
}
 0x121   :  { %s306_s16 = scalar_lea.hbm %s399_s3, 128 }
 0x122   :  { %p307_p7 = scmp.ne.s32.totalorder %s399_s3, %s306_s16  ;;  %p310_p8 = scmp.lt.u32.totalorder %s306_s16, %s399_s3 }
 0x124   :  { %p312_p9 = pnand %p310_p8, %p307_p7 }
 0x126   :  { %315 = shalt.err (!%p312_p9)
}
 0x127   :  { %158 = dma.vmem_to_hbm [thread:$0]  %s156_s12, 128, %s399_s3, [#allocation4]  }
 0x128   :  { %320 = dma.done.wait [#allocation4], 128  }
 0x129   :  { %321 = vsyncadd [#allocation4], 4294967168 }
 0x12a   :  { %162 = vsyncpa [#allocation3], 1 }
 0x12b   :  { %163 = vsyncpa [#allocation6], 1 }
 0x12c   :  { %164 = vsyncpa [#allocation4], 1 }

</bundles_post_ra>
